<compile_context>
chip_gen: v7x
topology: tpu7x:2x2x1
jax: 0.10.0
libtpu: 0.0.40
codegen_flags: <defaults>
</compile_context>

<pallas_src>
import jax
import jax.numpy as jnp
from jax.experimental import pallas as pl
from jax.experimental.pallas import tpu as pltpu

_LANES = 128      # lane width of a vreg
_SUBLANES = 8     # sublane depth of a vreg


def _sum_reduce_kernel(x_ref, o_ref, acc_ref):
    """Tiled sum reduction.

    x_ref:   (tile_rows, 128) block of the lane-dense repacked input.
    o_ref:   (1, 1) f32 scalar result in SMEM (written once, at the last step).
    acc_ref: (8, 128) f32 VMEM accumulator, persists across grid steps.
    """
    @pl.when(pl.program_id(0) == 0)
    def _init():
        acc_ref[...] = jnp.zeros_like(acc_ref)

    # Cast in-kernel (keeps HBM traffic at native width for sub-f32 inputs)
    # and accumulate element-wise on the VPU: reduce the (tile_rows/8, 8, 128)
    # view over its leading axis -> vreg-wise adds only, no XLU per step.
    blk = x_ref[...].astype(jnp.float32)
    acc_ref[...] += jnp.sum(blk.reshape(-1, _SUBLANES, _LANES), axis=0)

    @pl.when(pl.program_id(0) == pl.num_programs(0) - 1)
    def _finalize():
        # Single cross-lane/sublane reduction at the very end.
        o_ref[0, 0] = jnp.sum(acc_ref[...])


def _pallas_sum(x, tile_rows=8192):
    """sum(x) over all elements via a lane-dense, tiled Pallas reduction.

    tile_rows=8192 -> (8192, 128) f32 block = 4 MiB per buffer, 8 MiB
    double-buffered: safely under the scoped-VMEM default on v5e (16 MiB),
    v6e (32 MiB) and v7x (32 MiB) while amortizing per-grid-step overhead.
    """
    assert tile_rows % _SUBLANES == 0
    n = x.size
    flat = x.reshape(-1)

    # Lane-dense repack: pad with zeros (sum-preserving) to a whole number of
    # (tile_rows, 128) blocks, then view as (rows, 128).
    rows = pl.cdiv(n, _LANES)
    rows = pl.cdiv(rows, _SUBLANES) * _SUBLANES        # multiple of 8 sublanes
    tile_rows = min(tile_rows, rows)                   # don't over-pad tiny inputs
    grid = pl.cdiv(rows, tile_rows)
    rows = grid * tile_rows                            # multiple of the tile
    n_pad = rows * _LANES
    if n_pad != n:
        flat = jnp.pad(flat, (0, n_pad - n))
    x2d = flat.reshape(rows, _LANES)

    out = pl.pallas_call(
        _sum_reduce_kernel,
        out_shape=jax.ShapeDtypeStruct((1, 1), jnp.float32),
        grid_spec=pltpu.PrefetchScalarGridSpec(
            num_scalar_prefetch=0,
            grid=(grid,),
            in_specs=[pl.BlockSpec((tile_rows, _LANES), lambda i: (i, 0))],
            out_specs=pl.BlockSpec(memory_space=pltpu.SMEM),
            scratch_shapes=[pltpu.VMEM((_SUBLANES, _LANES), jnp.float32)],
        ),
        compiler_params=pltpu.CompilerParams(
            dimension_semantics=("arbitrary",),   # reduction axis: accumulator
        ),
    )(x2d)
    return out[0, 0]


def constant_buffer_forward(x, stuff, tile_rows=8192):
    """Pallas equivalent of ConstantBuffer.forward(x).

    new_stuff = 1.0 + stuff (int32 -> f32 promotion, as in torch), and
    sum(x + new_stuff) is computed as sum(x) + num_broadcast_rows * sum(new_stuff)
    so the kernel never touches the awkward trailing dim of 3.
    """
    assert x.shape[-1] == stuff.shape[0], "trailing dim must broadcast with buffer"
    data_sum = _pallas_sum(x, tile_rows=tile_rows)
    num_rows = x.size // x.shape[-1]
    new_stuff_sum = jnp.sum(1.0 + stuff.astype(jnp.float32))   # tiny scalar, wrapper-side
    return data_sum + jnp.float32(num_rows) * new_stuff_sum
    # TODO(synk): on v7x, add a leading "parallel" grid axis of size 2 to drive
    # both TensorCores for very large x; single-core is fine at these sizes.


if __name__ == "__main__":
    # Deterministic buffer, as in the module's __init__.
    stuff = jnp.array([1, 2, 3], dtype=jnp.int32)

    # Small input with trailing dim 3 so it broadcasts against the buffer.
    key = jax.random.PRNGKey(0)
    x = jax.random.normal(key, (2, 4, 64, 3), dtype=jnp.float32)

    # Use a small tile here so the tiny test input exercises the multi-step
    # grid accumulation path (init -> accumulate -> finalize).
    result = jax.block_until_ready(constant_buffer_forward(x, stuff, tile_rows=8))

    # Pure-JAX reference check.
    ref = jnp.sum(x + (1.0 + stuff.astype(jnp.float32)))
    assert jnp.allclose(result, ref, rtol=1e-5, atol=1e-3), (result, ref)

    print("KERNEL_OK")
</pallas_src>

<mosaic_0001>
module attributes {stable_mosaic.version = 11 : i64} {
  func.func @_sum_reduce_kernel(%arg0: i32, %arg1: memref<8x128xf32, #tpu.memory_space<vmem>>, %arg2: memref<1x1xf32, #tpu.memory_space<smem>>, %arg3: memref<8x128xf32, #tpu.memory_space<vmem>>) attributes {dimension_semantics = [#tpu.dimension_semantics<arbitrary>], iteration_bounds = array<i64: 2>, scalar_prefetch = 0 : i64, scratch_operands = 1 : i64, tpu.core_type = #tpu.core_type<tc>, window_params = [{transform_indices = @transform_0, window_bounds = array<i64: 8, 128>}, {transform_indices = @transform_1, window_bounds = array<i64: 1, 1>}]} {
    %c0_i32 = arith.constant 0 : i32
    %0 = arith.cmpi eq, %arg0, %c0_i32 : i32
    %1 = arith.extui %0 : i1 to i32
    %c0_i32_0 = arith.constant 0 : i32
    %2 = arith.cmpi ne, %1, %c0_i32_0 : i32
    scf.if %2 {
      %cst_7 = arith.constant 0.000000e+00 : f32
      %12 = vector.broadcast %cst_7 : f32 to vector<8x128xf32>
      %c0_8 = arith.constant 0 : index
      %c0_9 = arith.constant 0 : index
      %13 = vector.load %arg3[%c0_8, %c0_9] : memref<8x128xf32, #tpu.memory_space<vmem>>, vector<8x128xf32>
      tpu.vector_store %arg3[%c0_8, %c0_9], %12 {strides = array<i32>} : memref<8x128xf32, #tpu.memory_space<vmem>>, vector<8x128xf32>,
    } else {
    }
    %c0 = arith.constant 0 : index
    %c0_1 = arith.constant 0 : index
    %3 = vector.load %arg1[%c0, %c0_1] : memref<8x128xf32, #tpu.memory_space<vmem>>, vector<8x128xf32>
    %c0_2 = arith.constant 0 : index
    %c0_3 = arith.constant 0 : index
    %4 = vector.load %arg3[%c0_2, %c0_3] : memref<8x128xf32, #tpu.memory_space<vmem>>, vector<8x128xf32>
    %5 = vector.shape_cast %3 : vector<8x128xf32> to vector<1x8x128xf32>
    %cst = arith.constant dense<0.000000e+00> : vector<8x128xf32>
    %6 = vector.multi_reduction <add>, %5, %cst [0] : vector<1x8x128xf32> to vector<8x128xf32>
    %7 = arith.addf %4, %6 : vector<8x128xf32>
    %c0_4 = arith.constant 0 : index
    %c0_5 = arith.constant 0 : index
    %8 = vector.load %arg3[%c0_4, %c0_5] : memref<8x128xf32, #tpu.memory_space<vmem>>, vector<8x128xf32>
    tpu.vector_store %arg3[%c0_4, %c0_5], %7 {strides = array<i32>} : memref<8x128xf32, #tpu.memory_space<vmem>>, vector<8x128xf32>,
    %c1_i32 = arith.constant 1 : i32
    %9 = arith.cmpi eq, %arg0, %c1_i32 : i32
    %10 = arith.extui %9 : i1 to i32
    %c0_i32_6 = arith.constant 0 : i32
    %11 = arith.cmpi ne, %10, %c0_i32_6 : i32
    scf.if %11 {
      %c0_7 = arith.constant 0 : index
      %c0_8 = arith.constant 0 : index
      %12 = vector.load %arg3[%c0_7, %c0_8] : memref<8x128xf32, #tpu.memory_space<vmem>>, vector<8x128xf32>
      %13 = vector.shape_cast %12 : vector<8x128xf32> to vector<1x8x128xf32>
      %cst_9 = arith.constant dense<0.000000e+00> : vector<1xf32>
      %14 = vector.multi_reduction <add>, %13, %cst_9 [1, 2] : vector<1x8x128xf32> to vector<1xf32>
      %15 = vector.shape_cast %14 : vector<1xf32> to vector<1x1x1xf32>
      %16 = vector.extract %15[0, 0, 0] : f32 from vector<1x1x1xf32>
      %c0_10 = arith.constant 0 : index
      %c0_11 = arith.constant 0 : index
      %17 = memref.load %arg2[%c0_10, %c0_11] : memref<1x1xf32, #tpu.memory_space<smem>>
      memref.store %16, %arg2[%c0_10, %c0_11] : memref<1x1xf32, #tpu.memory_space<smem>>
    } else {
    }
    return
  }
  func.func @transform_0(%arg0: i32) -> (i32, i32) {
    %c0_i32 = arith.constant 0 : i32
    %c0_i32_0 = arith.constant 0 : i32
    return %arg0, %c0_i32 : i32, i32
  }
  func.func @transform_1(%arg0: i32) -> (i32, i32) {
    %c0_i32 = arith.constant 0 : i32
    %c0_i32_0 = arith.constant 0 : i32
    %c0_i32_1 = arith.constant 0 : i32
    return %c0_i32, %c0_i32_0 : i32, i32
  }
}

</mosaic_0001>

<bundles_post_ra>
// kernel: tpu_custom_call.1
= control target key start
LH: loop header
LB: loop body
LE: loop exit
PB: predicated region body
PF: predicated region fallthrough
CT: control target
= control target key end

     0   :  { %6 = vsyncpa [#allocation4], 0  ;;  %s476_s0 = inlined_call_operand.hbm [shape: f32[16,128], index: 0, kind: input, shape index: {}]   ;;  %s477_s1 = inlined_call_operand.hbm [shape: f32[1,1], index: 1, kind: output, shape index: {}]  }
   0x1   :  { %8 = vsyncpa [#allocation4 + $0x1], 0 }
   0x2   :  { %9 = vsyncpa [#allocation5], 0  ;;  %s359_s6 = smov 0   ;;  %s361_s7 = smov 0  }
   0x3   :  { %s363_s8 = smov 0   ;;  %s365_s9 = smov 0  }
   0x4 LB: > { %s378_s10 = sadd.s32 4294967295, %s344_s9   ;;  %s381_s11 = sadd.s32 1, %s344_s9   ;;  %s344_s9 = sphi %s365_s9, %s485_s9   ;;  %s340_s8 = sphi %s363_s8, %s484_s8   ;;  %s336_s7 = sphi %s361_s7, %s483_s7   ;;  %s332_s6 = sphi %s359_s6, %s482_s6  }
   0x5   : > { %s19_s12 = ssub.s32 %s344_s9, %s381_s11  ;;  %s22_s13 = sadd.s32 1, %s340_s8 }
   0x6   : > { %p20_p0 = scmp.eq.s32.totalorder %s19_s12, 0  ;;  %p29_p1 = scmp.ne.s32.totalorder %s340_s8, %s336_s7 }
   0x7   : > { %p30_p2 = scmp.eq.s32.totalorder %s344_s9, 0  ;;  %p35_p3 = scmp.ne.s32.totalorder %s336_s7, %s332_s6 }
   0x8   : > { %s391_s14 = scalar_select %p20_p0, %s340_s8, %s22_s13  }
   0x9   : > { %p31_p4 = por %p30_p2, %p29_p1  ;;  %p36_p5 = scmp.eq.s32.totalorder %s378_s10, 0 }
   0xa   : > { %p227_p6 = scmp.lt.s32.totalorder %s344_s9, 2  ;;  %s80_s16 = sand.u32 1, %s340_s8  }
   0xb   : > { %p395_p7 = por %p36_p5, %p35_p3  ;;  %s205_s17 = sshll.u32 %s80_s16, 3 }
   0xc   : > { %s206_s18 = sshll.u32 %s344_s9, 7  ;;  %s84_s22 = scalar_lea.vmem [#allocation3], %s205_s17 }
   0xd   : > { %s404_s21 = scalar_lea.hbm %s476_s0, %s206_s18  ;;  %s91_s23 = sshll.u32 %s84_s22, 4  ;;  %s406_s23 = int_to_ptr.vmem [resolvable:$true] %s91_s23 }
   0xe   : > { %p408_p8 = pnand %p227_p6, %p31_p4  ;;  %s81_s25 = scalar_lea.sflag [#allocation4], %s80_s16 }
   0xf   : > { %s264_s26 = scalar_lea.hbm %s404_s21, 128  ;;  %s269_s29 = scalar_lea.hbm %s476_s0, 256 }
  0x10   : > { %p265_p11 = scmp.ne.s32.totalorder %s404_s21, %s264_s26  ;;  %p266_p12 = pneg %p408_p8 }
  0x11   : > { %p270_p1 = scmp.lt.u32.totalorder %s404_s21, %s476_s0  ;;  %p271_p2 = scmp.lt.u32.totalorder %s269_s29, %s264_s26 }
  0x12   : > { %p267_p13 = pnand %p266_p12, %p265_p11  ;;  %p273_p4 = scmp.lt.u32.totalorder %s264_s26, %s404_s21 }
  0x13   : > { %p272_p3 = por %p271_p2, %p270_p1 }
  0x14   : > { %p268_p0 = pneg %p267_p13 }
  0x15   : > { %p274_p5 = por %p273_p4, %p272_p3 }
  0x17   : > { %p275_p6 = pnand %p274_p5, %p268_p0 }
  0x19   : > { %278 = shalt.err (!%p275_p6)
}
  0x1a   : > { %s279_s3 = scalar_lea.vmem %s406_s23, 128  ;;  %s346_s4 = smov [#allocation3]  }
  0x1b   : > { %p280_p11 = scmp.ne.s32.totalorder %s406_s23, %s279_s3  ;;  %s284_s5 = sshll.u32 %s346_s4, 4  ;;  %s285_s5 = int_to_ptr.vmem [resolvable:$false] %s284_s5 }
  0x1c   : > { %s286_s6 = scalar_lea.vmem %s285_s5, 256  ;;  %p287_p10 = scmp.lt.s32.totalorder %s406_s23, %s285_s5 }
  0x1d   : > { %p282_p13 = pnand %p280_p11, %p266_p12  ;;  %p288_p1 = scmp.lt.s32.totalorder %s286_s6, %s279_s3 }
  0x1f   : > { %p283_p9 = pneg %p282_p13  ;;  %p289_p2 = por %p288_p1, %p287_p10 }
  0x21   : > { %p290_p3 = pnand %p289_p2, %p283_p9 }
  0x23   : > { %293 = shalt.err (!%p290_p3)
}
  0x24   : > { %226 = dma.hbm_to_vmem [thread:$0]  (!%p408_p8), %s404_s21, 128, %s406_s23, %s81_s25  }
  0x25   : > { %p480_p0 = scmp.lt.s32.totalorder %s344_s9, 3  ;;  %p481_p4 = scmp.ge.s32.totalorder %s344_s9, 1 }
  0x27   : > { %p97_p12 = pnand %p481_p4, %p480_p0 }
  0x28   : > { %s102_s12 = sand.u32 (!%p97_p12), 1, %s336_s7  }
  0x29   : > { %100 = sbr.rel (%p97_p12) target bundleno = 289 (0x121), region = 24  ;;  %s208_s13 = sshll.u32 (!%p97_p12), %s102_s12, 3 }
  0x2a   : > { %s103_s16 = scalar_lea.sflag (!%p97_p12), [#allocation4], %s102_s12  ;;  %s106_s17 = scalar_lea.vmem (!%p97_p12), [#allocation3], %s208_s13 }
  0x30   : > { %323 = dma.done.wait (%p395_p7), %s103_s16, 128  }
  0x31   : > { %325 = vsyncadd (%p395_p7), %s103_s16, 4294967168  ;;  %p209_p9 = scmp.ne.s32.totalorder %s378_s10, 0 }
  0x32   : > { %v347_v0 = vmov (!%p209_p9), 0.0  }
  0x33   : > { %123 = sbr.rel (%p209_p9) target bundleno = 58 (0x3a), region = 32  ;;  %124 = vst [vmem:[#allocation2] sm:$0xff] (!%p209_p9), %v347_v0 }
  0x3a PF: > { %v125_v1 = vld [vmem:[%s106_s17] sm:$0xff]  ;;  %v126_v2 = vld [vmem:[#allocation2] sm:$0xff]  ;;  %p210_p8 = scmp.ne.s32.totalorder %s378_s10, 1 }
  0x3b   : > { %v128_v3 = vadd.f32 %v126_v2, %v125_v1 }
  0x3c   : > { %133 = sbr.rel (%p210_p8) target bundleno = 274 (0x112), region = 36 }
  0x3d   : > { %129 = vst [vmem:[#allocation2] sm:$0xff] %v128_v3 }
  0x44   : > { %v134_v4 = vld [vmem:[#allocation2] sm:$0xff] }
  0x45   : > { %135 = vadd.xlane.f32.xlu0 %v134_v4 }
  0xd2   : > { %v136_v5 = vpop.xlane.xlu0 %135 }
  0xd3   : > { %v137_v6 = vrot.slane %v136_v5, 4 }
  0xd5   : > { %v138_v7 = vadd.f32 %v137_v6, %v136_v5 }
  0xd7   : > { %v139_v8 = vrot.slane %v138_v7, 2 }
  0xd9   : > { %v140_v9 = vadd.f32 %v139_v8, %v138_v7 }
  0xdb   : > { %v141_v10 = vrot.slane %v140_v9, 1 }
  0xdd   : > { %v142_v11 = vadd.f32 %v141_v10, %v140_v9 }
  0xdf   : > { %215 = vpush %v142_v11 }
 0x110   : > { %s216_s9 = spop %215 }
 0x111   : > { %145 = sst [smem:[#allocation6]] %s216_s9 }
 0x112 PF: > { %p228_p7 = scmp.eq.s32.totalorder %s378_s10, 1  ;;  %s294_s19 = scalar_lea.hbm %s477_s1, 16 }
 0x113   : > { %p295_p10 = scmp.ne.s32.totalorder %s477_s1, %s294_s19  ;;  %p300_p11 = scmp.lt.u32.totalorder %s294_s19, %s477_s1 }
 0x115   : > { %p296_p5 = pnand %p295_p10, %p228_p7 }
 0x117   : > { %p297_p6 = pneg %p296_p5 }
 0x119   : > { %p302_p13 = pnand %p300_p11, %p297_p6 }
 0x11b   : > { %305 = shalt.err (!%p302_p13)
}
 0x11c   : > { %s348_s24 = smov [#allocation6]  }
 0x11d   : > { %220 = dma.smem_to_hbm (%p228_p7), %s348_s24, 16, %s477_s1, [#allocation5]  }
 0x11e   : > { %327 = dma.done.wait (%p228_p7), [#allocation5], 16  }
 0x11f   : > { %329 = vsyncadd (%p228_p7), [#allocation5], 4294967280 }
 0x120   : > { %159 = sfence }
 0x121 PF: > { %p12_p1 = scmp.ge.s32.totalorder %s381_s11, 4   ;;  %s482_s6 = smov %s336_s7 }
 0x122   : > { %s483_s7 = smov %s340_s8  ;;  %s484_s8 = smov %s391_s14 }
 0x123   : > { %s485_s9 = smov %s381_s11  ;;  %14 = sbr.rel (!%p12_p1) target bundleno = 4 (0x4), region = 70 }
 0x12a   :  { %165 = vsyncpa [#allocation4], 1 }
 0x12b   :  { %167 = vsyncpa [#allocation4 + $0x1], 1 }
 0x12c   :  { %168 = vsyncpa [#allocation5], 1 }
 0x12d   :  { %170 = vsyncpa [#allocation5 + $0x1], 1 }

</bundles_post_ra>
